<compile_context>
chip_gen: v7x
topology: tpu7x:2x2x1
jax: 0.10.0
libtpu: 0.0.40
codegen_flags: <defaults>
</compile_context>

<pallas_src>
import numpy as np
import jax
import jax.numpy as jnp
from jax.experimental import pallas as pl
from jax.experimental.pallas import tpu as pltpu


def _round_up(x, m):
    return (x + m - 1) // m * m


def _make_kernel(half_cols, ln_eps=1e-5):
    """Fused LayerNorm + Linear/Tanh + Linear/GLU + overlap-add accumulate.

    half_cols = C * w_pad (multiple of 128) is the GLU split point / accumulator
    width.  The overlap-add frequency offset is already baked into w2/b2 columns.
    """

    def kernel(x_ref, w1_ref, b1_ref, w2_ref, b2_ref, o_ref):
        band = pl.program_id(2)

        # Zero the VMEM-resident accumulator at the first band of each (B, T) tile.
        @pl.when(band == 0)
        def _zero():
            o_ref[...] = jnp.zeros_like(o_ref)

        # ---- LayerNorm (affine folded into W1/b1 on the host) ------------------
        x = x_ref[...].astype(jnp.float32)                    # (t_tile, E)
        mean = jnp.mean(x, axis=-1, keepdims=True)
        cx = x - mean
        var = jnp.mean(cx * cx, axis=-1, keepdims=True)
        xn = cx * jax.lax.rsqrt(var + ln_eps)

        # ---- hidden: Linear(emb->mlp) + Tanh (bf16 MXU, f32 accumulate) --------
        h = jnp.tanh(
            jnp.dot(xn.astype(w1_ref.dtype), w1_ref[...],
                    preferred_element_type=jnp.float32) + b1_ref[...])

        # ---- output: ONE Linear for both GLU halves, columns already scattered
        #      to lane-aligned accumulator positions on the host ------------------
        ag = jnp.dot(h.astype(w2_ref.dtype), w2_ref[...],
                     preferred_element_type=jnp.float32) + b2_ref[...]
        a = ag[:, :half_cols]          # 128-aligned static slices -> free views
        g = ag[:, half_cols:]

        # ---- overlap-add: padded / out-of-band columns are exactly zero --------
        o_ref[...] = o_ref[...] + a * jax.nn.sigmoid(g)

    return kernel


class OverlappingMaskEstimationModulePallas:
    """JAX/Pallas re-implementation of OverlappingMaskEstimationModule.forward.

    complex_mask=True (reim=2), hidden_activation='Tanh', use_freq_weights=False.
    """
    # TODO(synk): use_freq_weights=True path (per-band freq_weights buffers) not implemented.

    def __init__(self, in_channels, band_specs, n_freq, emb_dim, mlp_dim, key,
                 matmul_dtype=jnp.bfloat16, row_tile=256):
        band_specs = [(int(fs), int(fe)) for fs, fe in band_specs]
        # check_nonzero_bandwidth / check_no_gap equivalents
        for fs, fe in band_specs:
            assert fe > fs and 0 <= fs and fe <= n_freq
        for (_, fe0), (fs1, _) in zip(band_specs[:-1], band_specs[1:]):
            assert fs1 <= fe0, "gap between bands"

        self.in_channels = in_channels
        self.band_specs = band_specs
        self.n_freq = n_freq
        self.emb_dim = emb_dim
        self.mlp_dim = mlp_dim
        self.reim = 2                       # complex mask
        self.matmul_dtype = matmul_dtype    # bf16 MXU operands on v5e/v6e/v7x
        # Default row tile 256 fits comfortably on all generations; v6e (128 MiB
        # VMEM) can raise this to 512 to amortize per-band weight re-streaming,
        # v7x (64 MiB) should stay at <=256 (or 128 for very large n_freq).
        self.row_tile = row_tile
        self.w_pad = _round_up(2 * n_freq, 128)             # lane-dense per-channel width
        for fs, fe in band_specs:
            assert 2 * fe <= self.w_pad, "band extends past padded frequency slab"

        # ---- per-band parameters (same layout/math as the PyTorch NormMLP) -------
        C = in_channels
        self.raw_params = []
        for b, (fs, fe) in enumerate(band_specs):
            bw = fe - fs
            out_b = C * bw * self.reim                      # one GLU half
            kb = jax.random.fold_in(key, b)
            k1, k2, k3, k4, k5, k6 = jax.random.split(kb, 6)
            self.raw_params.append(dict(
                ln_gamma=1.0 + 0.2 * jax.random.normal(k5, (emb_dim,), jnp.float32),
                ln_beta=0.5 * jax.random.normal(k6, (emb_dim,), jnp.float32),
                w1=0.1 * jax.random.normal(k1, (emb_dim, mlp_dim), jnp.float32),
                b1=0.1 * jax.random.normal(k2, (mlp_dim,), jnp.float32),
                w2=0.1 * jax.random.normal(k3, (mlp_dim, 2 * out_b), jnp.float32),
                b2=0.1 * jax.random.normal(k4, (2 * out_b,), jnp.float32),
            ))
        self._pack_params()

    def _pack_params(self):
        """Fold LN affine into W1/b1; fold the per-band overlap-add scatter into
        W2/b2 (exact column placement); concatenate both GLU halves; stack bands."""
        C, w_pad, mlp = self.in_channels, self.w_pad, self.mlp_dim
        w1s, b1s, w2s, b2s = [], [], [], []
        for (fs, fe), p in zip(self.band_specs, self.raw_params):
            bw = fe - fs
            out_b = C * bw * 2
            # Fold LayerNorm affine into the first linear (exact in real arithmetic).
            w1f = p["ln_gamma"][:, None] * p["w1"]
            b1f = p["ln_beta"] @ p["w1"] + p["b1"]
            # GLU halves split on the host; scatter (band frequency offset) folded
            # into the weight/bias columns -> accumulator-aligned kernel output.
            w2a, w2b = p["w2"][:, :out_b], p["w2"][:, out_b:]
            b2a, b2b = p["b2"][:out_b], p["b2"][out_b:]

            def scat_w(w):  # (mlp, C*bw*2) -> (mlp, C*w_pad), column copy + zeros
                wp = jnp.zeros((mlp, C, w_pad), jnp.float32)
                wp = wp.at[:, :, 2 * fs:2 * fe].set(w.reshape(mlp, C, 2 * bw))
                return wp.reshape(mlp, C * w_pad)

            def scat_b(v):  # (C*bw*2,) -> (C*w_pad,)
                vp = jnp.zeros((C, w_pad), jnp.float32)
                vp = vp.at[:, 2 * fs:2 * fe].set(v.reshape(C, 2 * bw))
                return vp.reshape(C * w_pad)

            w1s.append(w1f)
            b1s.append(b1f)
            w2s.append(jnp.concatenate([scat_w(w2a), scat_w(w2b)], axis=-1))
            b2s.append(jnp.concatenate([scat_b(b2a), scat_b(b2b)], axis=-1))

        md = self.matmul_dtype
        self.w1_s = jnp.stack(w1s).astype(md)                        # (nb, E, mlp)
        self.b1_s = jnp.stack(b1s)[:, None, :].astype(jnp.float32)   # (nb, 1, mlp)
        self.w2_s = jnp.stack(w2s).astype(md)                        # (nb, mlp, 2*C*w_pad)
        self.b2_s = jnp.stack(b2s)[:, None, :].astype(jnp.float32)   # (nb, 1, 2*C*w_pad)

    # ------------------------------- Pallas path --------------------------------
    def forward(self, q):
        B, n_bands, T, E = q.shape
        assert n_bands == len(self.band_specs) and E == self.emb_dim
        C, w_pad, mlp = self.in_channels, self.w_pad, self.mlp_dim
        half_cols = C * w_pad

        t_tile = min(self.row_tile, _round_up(T, 8))
        T_pad = _round_up(T, t_tile)
        x = q.astype(jnp.float32)
        if T_pad != T:
            x = jnp.pad(x, ((0, 0), (0, 0), (0, T_pad - T), (0, 0)))

        grid = (B, T_pad // t_tile, n_bands)   # band axis innermost = accumulation
        kernel = _make_kernel(half_cols)

        # ---- explicit VMEM budget (double-buffered inputs + output + temps) -----
        bytes_in = (t_tile * E * 4                    # x block (f32)
                    + E * mlp * 2 + mlp * 4           # W1 (bf16) + b1 (f32)
                    + mlp * 2 * half_cols * 2         # W2 (bf16, both GLU halves)
                    + 2 * half_cols * 4)              # b2 (f32)
        bytes_out = t_tile * half_cols * 4            # resident accumulator block
        bytes_tmp = (4 * t_tile * half_cols * 4       # ag / a / g / glu temps
                     + 4 * t_tile * max(E, mlp) * 4)  # LN / hidden temps
        est = 2 * bytes_in + 2 * bytes_out + bytes_tmp
        vmem_cap = 64 << 20                           # conservative (v7x) fallback
        get_info = getattr(pltpu, "get_tpu_info", None)
        if get_info is not None:
            try:
                vmem_cap = int(get_info().vmem_capacity_bytes)
            except Exception:
                pass
        vmem_limit = int(min(max(est + (4 << 20), 32 << 20), vmem_cap * 7 // 8))

        acc = pl.pallas_call(
            kernel,
            out_shape=jax.ShapeDtypeStruct((B, T_pad, half_cols), jnp.float32),
            grid_spec=pltpu.PrefetchScalarGridSpec(
                num_scalar_prefetch=0,
                grid=grid,
                in_specs=[
                    # q indexed directly (no host transpose): (B, n_bands, T, E)
                    pl.BlockSpec((None, None, t_tile, E),
                                 lambda ib, it, b: (ib, b, it, 0)),
                    pl.BlockSpec((None, E, mlp), lambda ib, it, b: (b, 0, 0)),
                    pl.BlockSpec((None, 1, mlp), lambda ib, it, b: (b, 0, 0)),
                    pl.BlockSpec((None, mlp, 2 * half_cols),
                                 lambda ib, it, b: (b, 0, 0)),
                    pl.BlockSpec((None, 1, 2 * half_cols),
                                 lambda ib, it, b: (b, 0, 0)),
                ],
                # Constant over the band axis -> accumulator stays resident in VMEM
                # and is written back to HBM once per (B, T) tile.
                out_specs=pl.BlockSpec((None, t_tile, half_cols),
                                       lambda ib, it, b: (ib, it, 0)),
            ),
            compiler_params=pltpu.CompilerParams(
                dimension_semantics=("parallel", "parallel", "arbitrary"),
                vmem_limit_bytes=vmem_limit),
        )(x, self.w1_s, self.b1_s, self.w2_s, self.b2_s)

        # Strip time/freq padding, pair real/imag once, single final transpose.
        acc = acc[:, :T].reshape(B, T, C, w_pad)[:, :, :, : 2 * self.n_freq]
        acc = acc.reshape(B, T, C, self.n_freq, 2)
        masks = jax.lax.complex(acc[..., 0], acc[..., 1])        # (B, T, C, n_freq)
        return jnp.transpose(masks, (0, 2, 3, 1))                # (B, C, n_freq, T)

    # ---------------------------- pure-JAX reference ----------------------------
    def forward_reference(self, q):
        """Straightforward per-band overlap-add reference (same math, same dtypes)."""
        B, n_bands, T, E = q.shape
        C, md = self.in_channels, self.matmul_dtype
        masks = jnp.zeros((B, C, self.n_freq, T), jnp.complex64)
        for b, (fs, fe) in enumerate(self.band_specs):
            bw = fe - fs
            p = self.raw_params[b]
            x = q[:, b].reshape(B * T, E).astype(jnp.float32)
            mean = jnp.mean(x, axis=-1, keepdims=True)
            var = jnp.mean((x - mean) ** 2, axis=-1, keepdims=True)
            xn = (x - mean) * jax.lax.rsqrt(var + 1e-5)
            xn = xn * p["ln_gamma"] + p["ln_beta"]
            h = jnp.tanh(jnp.dot(xn.astype(md), p["w1"].astype(md),
                                 preferred_element_type=jnp.float32) + p["b1"])
            o = jnp.dot(h.astype(md), p["w2"].astype(md),
                        preferred_element_type=jnp.float32) + p["b2"]
            half = o.shape[-1] // 2
            mb = o[:, :half] * jax.nn.sigmoid(o[:, half:])
            mb = mb.reshape(B, T, C, bw, 2)
            mbc = jax.lax.complex(mb[..., 0], mb[..., 1])
            mbc = jnp.transpose(mbc, (0, 2, 3, 1))               # (B, C, bw, T)
            masks = masks.at[:, :, fs:fe, :].add(mbc)
        return masks


if __name__ == "__main__":
    key = jax.random.PRNGKey(0)
    # Small shapes consistent with the module's forward.
    batch, n_time, emb_dim, mlp_dim, in_channels = 2, 8, 32, 32, 2
    band_specs = [(0, 6), (4, 10), (8, 16)]   # nonzero-bandwidth, no-gap, overlapping
    n_freq = 16

    kq, kp = jax.random.split(key)
    q = jax.random.normal(kq, (batch, len(band_specs), n_time, emb_dim), jnp.float32)

    module = OverlappingMaskEstimationModulePallas(
        in_channels=in_channels,
        band_specs=band_specs,
        n_freq=n_freq,
        emb_dim=emb_dim,
        mlp_dim=mlp_dim,
        key=kp,
    )

    out = jax.block_until_ready(module.forward(q))
    assert out.shape == (batch, in_channels, n_freq, n_time)
    assert out.dtype == jnp.complex64

    ref = jax.block_until_ready(module.forward_reference(q))
    # bf16 MXU operands (f32 accumulate) + LN-affine folding => small numeric drift
    # vs the unfused reference; tolerances sized accordingly.
    np.testing.assert_allclose(np.asarray(out), np.asarray(ref), rtol=2e-2, atol=1e-2)

    print("KERNEL_OK")
</pallas_src>

<mosaic_0001>
module attributes {stable_mosaic.version = 11 : i64} {
  func.func @kernel(%arg0: i32, %arg1: i32, %arg2: i32, %arg3: memref<1x1x8x32xf32, #tpu.memory_space<vmem>>, %arg4: memref<1x32x32xbf16, #tpu.memory_space<vmem>>, %arg5: memref<1x1x32xf32, #tpu.memory_space<vmem>>, %arg6: memref<1x32x512xbf16, #tpu.memory_space<vmem>>, %arg7: memref<1x1x512xf32, #tpu.memory_space<vmem>>, %arg8: memref<1x8x256xf32, #tpu.memory_space<vmem>>) attributes {dimension_semantics = [#tpu.dimension_semantics<parallel>, #tpu.dimension_semantics<parallel>, #tpu.dimension_semantics<arbitrary>], iteration_bounds = array<i64: 2, 1, 3>, scalar_prefetch = 0 : i64, scratch_operands = 0 : i64, tpu.core_type = #tpu.core_type<tc>, window_params = [{transform_indices = @transform_0, window_bounds = array<i64: 1, 1, 8, 32>}, {transform_indices = @transform_1, window_bounds = array<i64: 1, 32, 32>}, {transform_indices = @transform_2, window_bounds = array<i64: 1, 1, 32>}, {transform_indices = @transform_3, window_bounds = array<i64: 1, 32, 512>}, {transform_indices = @transform_4, window_bounds = array<i64: 1, 1, 512>}, {transform_indices = @transform_5, window_bounds = array<i64: 1, 8, 256>}]} {
    %c0_i32 = arith.constant 0 : i32
    %0 = arith.cmpi eq, %arg2, %c0_i32 : i32
    %1 = arith.extui %0 : i1 to i32
    %c0_i32_0 = arith.constant 0 : i32
    %2 = arith.cmpi ne, %1, %c0_i32_0 : i32
    scf.if %2 {
      %cst_29 = arith.constant 0.000000e+00 : f32
      %52 = vector.broadcast %cst_29 : f32 to vector<8x256xf32>
      %c0_30 = arith.constant 0 : index
      %c0_31 = arith.constant 0 : index
      %c0_32 = arith.constant 0 : index
      %53 = vector.load %arg8[%c0_30, %c0_31, %c0_32] : memref<1x8x256xf32, #tpu.memory_space<vmem>>, vector<1x8x256xf32>
      %54 = vector.shape_cast %53 : vector<1x8x256xf32> to vector<8x256xf32>
      %55 = vector.shape_cast %52 : vector<8x256xf32> to vector<1x8x256xf32>
      tpu.vector_store %arg8[%c0_30, %c0_31, %c0_32], %55 {strides = array<i32>} : memref<1x8x256xf32, #tpu.memory_space<vmem>>, vector<1x8x256xf32>,
    } else {
    }
    %c0 = arith.constant 0 : index
    %c0_1 = arith.constant 0 : index
    %c0_2 = arith.constant 0 : index
    %c0_3 = arith.constant 0 : index
    %3 = vector.load %arg3[%c0, %c0_1, %c0_2, %c0_3] : memref<1x1x8x32xf32, #tpu.memory_space<vmem>>, vector<1x1x8x32xf32>
    %4 = vector.shape_cast %3 : vector<1x1x8x32xf32> to vector<8x32xf32>
    %cst = arith.constant dense<0.000000e+00> : vector<8xf32>
    %5 = vector.multi_reduction <add>, %4, %cst [1] : vector<8x32xf32> to vector<8xf32>
    %6 = vector.shape_cast %5 : vector<8xf32> to vector<8x1xf32>
    %cst_4 = arith.constant 3.200000e+01 : f32
    %7 = vector.broadcast %cst_4 : f32 to vector<8x1xf32>
    %8 = arith.divf %6, %7 : vector<8x1xf32>
    %9 = vector.broadcast %8 : vector<8x1xf32> to vector<8x32xf32>
    %10 = arith.subf %4, %9 : vector<8x32xf32>
    %11 = arith.mulf %10, %10 : vector<8x32xf32>
    %cst_5 = arith.constant dense<0.000000e+00> : vector<8xf32>
    %12 = vector.multi_reduction <add>, %11, %cst_5 [1] : vector<8x32xf32> to vector<8xf32>
    %13 = vector.shape_cast %12 : vector<8xf32> to vector<8x1xf32>
    %cst_6 = arith.constant 3.200000e+01 : f32
    %14 = vector.broadcast %cst_6 : f32 to vector<8x1xf32>
    %15 = arith.divf %13, %14 : vector<8x1xf32>
    %cst_7 = arith.constant 9.99999974E-6 : f32
    %16 = vector.broadcast %cst_7 : f32 to vector<8x1xf32>
    %17 = arith.addf %15, %16 : vector<8x1xf32>
    %18 = math.rsqrt %17 : vector<8x1xf32>
    %19 = vector.broadcast %18 : vector<8x1xf32> to vector<8x32xf32>
    %20 = arith.mulf %10, %19 : vector<8x32xf32>
    %21 = arith.truncf %20 : vector<8x32xf32> to vector<8x32xbf16>
    %c0_8 = arith.constant 0 : index
    %c0_9 = arith.constant 0 : index
    %c0_10 = arith.constant 0 : index
    %22 = vector.load %arg4[%c0_8, %c0_9, %c0_10] : memref<1x32x32xbf16, #tpu.memory_space<vmem>>, vector<1x32x32xbf16>
    %23 = vector.shape_cast %22 : vector<1x32x32xbf16> to vector<32x32xbf16>
    %cst_11 = arith.constant dense<0.000000e+00> : vector<8x32xf32>
    %24 = tpu.matmul %21, %23, %cst_11 {dimension_numbers = #tpu.dot_dimension_numbers<[1], [0], [0], [1], [0, 0, 1, 1], [], []>} : vector<8x32xbf16>, vector<32x32xbf16>, vector<8x32xf32> -> vector<8x32xf32>
    %c0_12 = arith.constant 0 : index
    %c0_13 = arith.constant 0 : index
    %c0_14 = arith.constant 0 : index
    %25 = vector.load %arg5[%c0_12, %c0_13, %c0_14] : memref<1x1x32xf32, #tpu.memory_space<vmem>>, vector<1x1x32xf32>
    %26 = vector.shape_cast %25 : vector<1x1x32xf32> to vector<1x32xf32>
    %27 = vector.broadcast %26 : vector<1x32xf32> to vector<8x32xf32>
    %28 = arith.addf %24, %27 : vector<8x32xf32>
    %29 = math.tanh %28 : vector<8x32xf32>
    %30 = arith.truncf %29 : vector<8x32xf32> to vector<8x32xbf16>
    %c0_15 = arith.constant 0 : index
    %c0_16 = arith.constant 0 : index
    %c0_17 = arith.constant 0 : index
    %31 = vector.load %arg6[%c0_15, %c0_16, %c0_17] : memref<1x32x512xbf16, #tpu.memory_space<vmem>>, vector<1x32x512xbf16>
    %32 = vector.shape_cast %31 : vector<1x32x512xbf16> to vector<32x512xbf16>
    %cst_18 = arith.constant dense<0.000000e+00> : vector<8x512xf32>
    %33 = tpu.matmul %30, %32, %cst_18 {dimension_numbers = #tpu.dot_dimension_numbers<[1], [0], [0], [1], [0, 0, 1, 1], [], []>} : vector<8x32xbf16>, vector<32x512xbf16>, vector<8x512xf32> -> vector<8x512xf32>
    %c0_19 = arith.constant 0 : index
    %c0_20 = arith.constant 0 : index
    %c0_21 = arith.constant 0 : index
    %34 = vector.load %arg7[%c0_19, %c0_20, %c0_21] : memref<1x1x512xf32, #tpu.memory_space<vmem>>, vector<1x1x512xf32>
    %35 = vector.shape_cast %34 : vector<1x1x512xf32> to vector<1x512xf32>
    %36 = vector.broadcast %35 : vector<1x512xf32> to vector<8x512xf32>
    %37 = arith.addf %33, %36 : vector<8x512xf32>
    %38 = vector.extract_strided_slice %37 {offsets = [0, 0], sizes = [8, 256], strides = [1, 1]} : vector<8x512xf32> to vector<8x256xf32>
    %39 = vector.extract_strided_slice %37 {offsets = [0, 256], sizes = [8, 256], strides = [1, 1]} : vector<8x512xf32> to vector<8x256xf32>
    %c0_22 = arith.constant 0 : index
    %c0_23 = arith.constant 0 : index
    %c0_24 = arith.constant 0 : index
    %40 = vector.load %arg8[%c0_22, %c0_23, %c0_24] : memref<1x8x256xf32, #tpu.memory_space<vmem>>, vector<1x8x256xf32>
    %41 = vector.shape_cast %40 : vector<1x8x256xf32> to vector<8x256xf32>
    %42 = arith.negf %39 : vector<8x256xf32>
    %43 = math.exp %42 : vector<8x256xf32>
    %cst_25 = arith.constant 1.000000e+00 : f32
    %44 = vector.broadcast %cst_25 : f32 to vector<8x256xf32>
    %45 = arith.addf %44, %43 : vector<8x256xf32>
    %46 = arith.divf %44, %45 : vector<8x256xf32>
    %47 = arith.mulf %38, %46 : vector<8x256xf32>
    %48 = arith.addf %41, %47 : vector<8x256xf32>
    %c0_26 = arith.constant 0 : index
    %c0_27 = arith.constant 0 : index
    %c0_28 = arith.constant 0 : index
    %49 = vector.load %arg8[%c0_26, %c0_27, %c0_28] : memref<1x8x256xf32, #tpu.memory_space<vmem>>, vector<1x8x256xf32>
    %50 = vector.shape_cast %49 : vector<1x8x256xf32> to vector<8x256xf32>
    %51 = vector.shape_cast %48 : vector<8x256xf32> to vector<1x8x256xf32>
    tpu.vector_store %arg8[%c0_26, %c0_27, %c0_28], %51 {strides = array<i32>} : memref<1x8x256xf32, #tpu.memory_space<vmem>>, vector<1x8x256xf32>,
    return
  }
  func.func @transform_0(%arg0: i32, %arg1: i32, %arg2: i32) -> (i32, i32, i32, i32) {
    %c0_i32 = arith.constant 0 : i32
    %c0_i32_0 = arith.constant 0 : i32
    return %arg0, %arg2, %arg1, %c0_i32 : i32, i32, i32, i32
  }
  func.func @transform_1(%arg0: i32, %arg1: i32, %arg2: i32) -> (i32, i32, i32) {
    %c0_i32 = arith.constant 0 : i32
    %c0_i32_0 = arith.constant 0 : i32
    %c0_i32_1 = arith.constant 0 : i32
    return %arg2, %c0_i32, %c0_i32_0 : i32, i32, i32
  }
  func.func @transform_2(%arg0: i32, %arg1: i32, %arg2: i32) -> (i32, i32, i32) {
    %c0_i32 = arith.constant 0 : i32
    %c0_i32_0 = arith.constant 0 : i32
    %c0_i32_1 = arith.constant 0 : i32
    return %arg2, %c0_i32, %c0_i32_0 : i32, i32, i32
  }
  func.func @transform_3(%arg0: i32, %arg1: i32, %arg2: i32) -> (i32, i32, i32) {
    %c0_i32 = arith.constant 0 : i32
    %c0_i32_0 = arith.constant 0 : i32
    %c0_i32_1 = arith.constant 0 : i32
    return %arg2, %c0_i32, %c0_i32_0 : i32, i32, i32
  }
  func.func @transform_4(%arg0: i32, %arg1: i32, %arg2: i32) -> (i32, i32, i32) {
    %c0_i32 = arith.constant 0 : i32
    %c0_i32_0 = arith.constant 0 : i32
    %c0_i32_1 = arith.constant 0 : i32
    return %arg2, %c0_i32, %c0_i32_0 : i32, i32, i32
  }
  func.func @transform_5(%arg0: i32, %arg1: i32, %arg2: i32) -> (i32, i32, i32) {
    %c0_i32 = arith.constant 0 : i32
    %c0_i32_0 = arith.constant 0 : i32
    return %arg0, %arg1, %c0_i32 : i32, i32, i32
  }
}

</mosaic_0001>

<bundles_post_ra>
// kernel: tpu_custom_call.1
= control target key start
LH: loop header
LB: loop body
LE: loop exit
PB: predicated region body
PF: predicated region fallthrough
CT: control target
= control target key end

     0   :  { %s1750_s0 = inlined_call_operand.hbm [shape: f32[2,3,8,32], index: 0, kind: input, shape index: {}]   ;;  %s1751_s1 = inlined_call_operand.hbm [shape: bf16[3,32,32], index: 1, kind: input, shape index: {}]   ;;  %s1752_s2 = inlined_call_operand.vmem [shape: f32[3,1,32], index: 2, kind: input, shape index: {}]   ;;  %s1753_s3 = inlined_call_operand.hbm [shape: bf16[3,32,512], index: 3, kind: input, shape index: {}]   ;;  %s1754_s4 = inlined_call_operand.vmem [shape: f32[3,1,512], index: 4, kind: input, shape index: {}]   ;;  %s1755_s5 = inlined_call_operand.hbm [shape: f32[2,8,256], index: 5, kind: output, shape index: {}]  }
   0x1   :  { %1772 = sst [smem:[#allocation24_spill]] %s1751_s1 }
   0x2   :  { %1773 = sst [smem:[#allocation25_spill]] %s1752_s2 }
   0x3   :  { %1774 = sst [smem:[#allocation26_spill]] %s1754_s4 }
   0x4   :  { %1775 = sst [smem:[#allocation27_spill]] %s1755_s5 }
   0x5   :  { %10 = vsyncpa [#allocation3], 0 }
   0x6   :  { %12 = vsyncpa [#allocation3 + $0x1], 0 }
   0x7   :  { %13 = vsyncpa [#allocation6], 0 }
   0x8   :  { %15 = vsyncpa [#allocation6 + $0x1], 0 }
   0x9   :  { %16 = vsyncpa [#allocation4], 0 }
   0xa   :  { %18 = vsyncpa [#allocation4 + $0x1], 0  ;;  %s1323_s18 = smov 0   ;;  %s1325_s19 = smov 0  }
   0xb   :  { %s1327_s20 = smov 0   ;;  %s1329_s21 = smov 0  }
   0xc   :  { %s1331_s22 = smov 0   ;;  %s1333_s23 = smov 0  }
   0xd   :  { %s1335_s24 = smov 0   ;;  %s1337_s25 = smov 0  }
   0xe   :  { %s1339_s26 = smov 0   ;;  %s1341_s27 = smov 0  }
   0xf   :  { %s1343_s28 = smov 0   ;;  %s1345_s29 = smov 0  }
  0x10   :  { %s1347_s30 = smov 0   ;;  %s1349_s6 = smov 0  }
  0x11 LB: > { %1776 = sst [smem:[#allocation12_spill]] %s1235_s20  ;;  %p62_p0 = scmp.eq.s32.totalorder %s1279_s6, 0  ;;  %s1279_s6 = sphi %s1349_s6, %s24_s6   ;;  %s1275_s30 = sphi %s1347_s30, %s1825_s30   ;;  %s1271_s29 = sphi %s1345_s29, %s1833_s29   ;;  %s1267_s28 = sphi %s1343_s28, %s1823_s28   ;;  %s1263_s27 = sphi %s1341_s27, %s1832_s27   ;;  %s1259_s26 = sphi %s1339_s26, %s1822_s26   ;;  %s1255_s25 = sphi %s1337_s25, %s1831_s25   ;;  %s1251_s24 = sphi %s1335_s24, %s1830_s24   ;;  %s1247_s23 = sphi %s1333_s23, %s1820_s23   ;;  %s1243_s22 = sphi %s1331_s22, %s1829_s22   ;;  %s1239_s21 = sphi %s1329_s21, %s1828_s21   ;;  %s1235_s20 = sphi %s1327_s20, %s1818_s20   ;;  %s1231_s19 = sphi %s1325_s19, %s1827_s19   ;;  %s1227_s18 = sphi %s1323_s18, %s1826_s18  }
  0x12   : > { %1777 = sst [smem:[#allocation13_spill]] %s1247_s23  ;;  %p87_p1 = scmp.ne.s32.totalorder %s1247_s23, %s1243_s22 }
  0x13   : > { %1778 = sst [smem:[#allocation14_spill]] %s1259_s26  ;;  %p1757_p3 = scmp.lt.s32.totalorder %s1279_s6, 6 }
  0x14   : > { %1779 = sst [smem:[#allocation15_spill]] %s1263_s27  ;;  %p89_p4 = por %p87_p1, %p62_p0 }
  0x15   : > { %1780 = sst [smem:[#allocation16_spill]] %s1267_s28  ;;  %s244_s8 = sand.u32 1, %s1279_s6  }
  0x16   : > { %1781 = sst [smem:[#allocation17_spill]] %s1275_s30  ;;  %s1756_s9 = sand.u32 1, %s1247_s23  }
  0x17   : > { %s820_s10 = sshll.u32 %s1756_s9, 4  ;;  %s854_s11 = sshll.u32 %s1271_s29, 8 }
  0x18   : > { %s1782_s1 = sld [smem:[#allocation24_spill]]  ;;  %s248_s15 = scalar_lea.vmem [#allocation5], %s820_s10 }
  0x19   : > { %s255_s16 = sshll.u32 %s248_s15, 4  ;;  %p1414_p5 = pnand %p1757_p3, %p89_p4  ;;  %s1418_s16 = int_to_ptr.vmem [resolvable:$true] %s255_s16 }
  0x1a   : > { %s1420_s7 = scalar_lea.sflag [#allocation6], %s244_s8 }
  0x1b   : > { %p1762_p7 = pneg %p1414_p5 }
  0x1e   : > { %s1410_s14 = scalar_lea.hbm %s1782_s1, %s854_s11  ;;  %s1044_s13 = scalar_lea.hbm %s1782_s1, 768 }
  0x1f   : > { %s1039_s12 = scalar_lea.hbm %s1410_s14, 256  ;;  %p1045_p10 = scmp.lt.u32.totalorder %s1410_s14, %s1782_s1 }
  0x20   : > { %p1040_p6 = scmp.ne.s32.totalorder %s1410_s14, %s1039_s12  ;;  %p1046_p11 = scmp.lt.u32.totalorder %s1044_s13, %s1039_s12 }
  0x21   : > { %p1048_p13 = scmp.lt.u32.totalorder %s1039_s12, %s1410_s14 }
  0x22   : > { %p1042_p8 = pnand %p1762_p7, %p1040_p6  ;;  %p1047_p12 = por %p1046_p11, %p1045_p10 }
  0x24   : > { %p1043_p9 = pneg %p1042_p8  ;;  %p1049_p1 = por %p1048_p13, %p1047_p12 }
  0x26   : > { %p1050_p4 = pnand %p1049_p1, %p1043_p9 }
  0x28   : > { %1053 = shalt.err (!%p1050_p4)
}
  0x29   : > { %s1054_s8 = scalar_lea.vmem %s1418_s16, 256  ;;  %s1281_s10 = smov [#allocation5]  }
  0x2a   : > { %p1055_p6 = scmp.ne.s32.totalorder %s1418_s16, %s1054_s8  ;;  %s1059_s11 = sshll.u32 %s1281_s10, 4  ;;  %s1060_s11 = int_to_ptr.vmem [resolvable:$false] %s1059_s11 }
  0x2b   : > { %s1061_s9 = scalar_lea.vmem %s1060_s11, 512  ;;  %p1062_p2 = scmp.lt.s32.totalorder %s1418_s16, %s1060_s11 }
  0x2c   : > { %p1057_p8 = pnand %p1055_p6, %p1762_p7  ;;  %p1063_p10 = scmp.lt.s32.totalorder %s1061_s9, %s1054_s8 }
  0x2e   : > { %p1058_p3 = pneg %p1057_p8  ;;  %p1064_p11 = por %p1063_p10, %p1062_p2 }
  0x30   : > { %p1065_p12 = pnand %p1064_p11, %p1058_p3 }
  0x32   : > { %1068 = shalt.err (!%p1065_p12)
}
  0x33   : > { %s1282_s12 = smov 64   ;;  %s1283_s13 = smov 4  }
  0x34   : > { %883 = dma.hbm_to_vmem [thread:$0]  (!%p1414_p5), %s1410_s14, 256, %s1418_s16, %s1420_s7, %s1282_s12, %s1282_s12, %s1283_s13  }
  0x35   : > { %s1784_s15 = sand.u32 1, %s1247_s23   ;;  %p826_p2 = scmp.ge.s32.totalorder %s1279_s6, 1 }
  0x36   : > { %s823_s8 = sshll.u32 %s1784_s15, 6  ;;  %p297_p3 = scmp.lt.s32.totalorder %s1279_s6, 7 }
  0x37   : > { %s275_s10 = scalar_lea.vmem [#allocation7], %s823_s8  ;;  %s1459_s1 = sadd.s32 4294967295, %s1279_s6  }
  0x38   : > { %s1452_s11 = sshll.u32 %s275_s10, 4  ;;  %p1454_p9 = pnand %p826_p2, %p297_p3  ;;  %s1573_s11 = int_to_ptr.vmem [resolvable:$true] %s1452_s11 }
  0x39   : > { %s36_s14 = sadd.s32 1, %s1271_s29  ;;  %s43_s16 = sadd.s32 1, %s1275_s30 }
  0x3a   : > { %s1785_s9 = scalar_select %p1454_p9, 1, 0 }
  0x3b   : > { %p37_p13 = scmp.ge.s32.totalorder %s36_s14, 3  ;;  %s54_s12 = sadd.s32 1, %s1259_s26 }
  0x3c   : > { %p61_p1 = scmp.ne.s32.totalorder %s1259_s26, %s1255_s25  ;;  %p67_p4 = scmp.ne.s32.totalorder %s1255_s25, %s1251_s24 }
  0x3d   : > { %s1835_s14 = smov (%p37_p13, %s36_s14), 0  ;;  %s1837_s16 = smov (!%p37_p13, %s43_s16), %s1275_s30 }
  0x3e   : > { %1786 = sst [smem:[#allocation18_spill]] %s1835_s14  ;;  %s48_s13 = ssub.s32 %s1271_s29, %s1835_s14 }
  0x3f   : > { %p1476_p6 = por %p62_p0, %p61_p1  ;;  %p45_p8 = scmp.ge.s32.totalorder %s1837_s16, 2 }
  0x40   : > { %p68_p10 = scmp.eq.s32.totalorder %s1459_s1, 0  ;;  %p78_p11 = scmp.eq.s32.totalorder %s48_s13, 0 }
  0x41   : > { %s186_s24 = sadd.s32 1, %s1235_s20  ;;  %s1839_s16 = smov (%p45_p8, %s1837_s16), 0 }
  0x42   : > { %1788 = sst [smem:[#allocation19_spill]] %s1839_s16  ;;  %p1484_p12 = por %p68_p10, %p67_p4 }
  0x43   : > { %p1790_p0 = scmp.ne.s32.totalorder %s1243_s22, %s1239_s21  ;;  %s47_s5 = ssub.s32 %s1275_s30, %s1839_s16 }
  0x44   : > { %s1789_s8 = scalar_select %p1484_p12, 1, 0 }
  0x45   : > { %p1491_p2 = por %p1790_p0, %p68_p10  ;;  %p196_p3 = scmp.ne.s32.totalorder %s1235_s20, %s1231_s19 }
  0x46   : > { %s49_s14 = sor.u32 %s48_s13, %s47_s5  ;;  %p184_p13 = scmp.eq.s32.totalorder %s47_s5, 0 }
  0x47   : > { %s1791_s10 = scalar_select %p1491_p2, 1, 0 }
  0x48   : > { %p52_p1 = scmp.eq.s32.totalorder %s49_s14, 0  ;;  %p197_p8 = scmp.eq.s32.totalorder %s1459_s1, 5 }
  0x49   : > { %1792 = sst [smem:[#allocation20_spill]] %s1791_s10  ;;  %s1793_s28 = sadd.s32 1, %s1247_s23 }
  0x4a   : > { %s1503_s4 = scalar_select %p78_p11, %s1247_s23, %s1793_s28  }
  0x4b   : > { %s1506_s2 = scalar_select %p52_p1, %s1259_s26, %s54_s12  }
  0x4c   : > { %1794 = sst [smem:[#allocation21_spill]] %s1503_s4  ;;  %p1511_p4 = por %p197_p8, %p196_p3 }
  0x4d   : > { %1795 = sst [smem:[#allocation22_spill]] %s1506_s2  ;;  %p202_p10 = scmp.ne.s32.totalorder %s1231_s19, %s1227_s18 }
  0x4e   : > { %s1509_s21 = scalar_select %p184_p13, %s1235_s20, %s186_s24  }
  0x4f   : > { %s1797_s27 = scalar_select %p1511_p4, 1, 0 }
  0x50   : > { %1796 = sst [smem:[#allocation23_spill]] %s1509_s21  ;;  %s1798_s13 = sadd.s32 4294967294, %s1279_s6  }
  0x51   : > { %p203_p0 = scmp.eq.s32.totalorder %s1798_s13, 5  ;;  %s223_s5 = sand.u32 1, %s1259_s26  }
  0x52   : > { %s818_s16 = sshll.u32 %s223_s5, 3  ;;  %s868_s10 = smul.u32 3, %s1275_s30 }
  0x53   : > { %p1520_p7 = por %p203_p0, %p202_p10  ;;  %s227_s28 = scalar_lea.vmem [#allocation2], %s818_s16 }
  0x54   : > { %s237_s4 = sshll.u32 %s227_s28, 4  ;;  %p1800_p11 = scmp.lt.s32.totalorder %s1279_s6, 6  ;;  %s1525_s4 = int_to_ptr.vmem [resolvable:$true] %s237_s4 }
  0x55   : > { %s1799_s14 = scalar_select %p1520_p7, 1, 0 }
  0x56   : > { %p1531_p3 = pnand %p1800_p11, %p1476_p6  ;;  %s233_s24 = sadd.s32 %s1271_s29, %s868_s10 }
  0x57   : > { %s855_s13 = sshll.u32 %s1271_s29, 10  ;;  %s819_s2 = sshll.u32 %s233_s24, 7 }
  0x58   : > { %s1540_s21 = scalar_lea.hbm %s1750_s0, %s819_s2  ;;  %s1545_s15 = scalar_lea.hbm %s1753_s3, %s855_s13 }
  0x59   : > { %s224_s30 = scalar_lea.sflag [#allocation3], %s223_s5  ;;  %s1069_s20 = scalar_lea.hbm %s1540_s21, 128 }
  0x5a   : > { %p1070_p6 = scmp.ne.s32.totalorder %s1540_s21, %s1069_s20  ;;  %p1071_p13 = pneg %p1531_p3 }
  0x5b   : > { %s1074_s26 = scalar_lea.hbm %s1750_s0, 768  ;;  %p1075_p10 = scmp.lt.u32.totalorder %s1540_s21, %s1750_s0 }
  0x5c   : > { %p1072_p1 = pnand %p1071_p13, %p1070_p6  ;;  %p1076_p0 = scmp.lt.u32.totalorder %s1074_s26, %s1069_s20 }
  0x5d   : > { %p1078_p7 = scmp.lt.u32.totalorder %s1069_s20, %s1540_s21 }
  0x5e   : > { %p1073_p8 = pneg %p1072_p1  ;;  %p1077_p11 = por %p1076_p0, %p1075_p10 }
  0x60   : > { %p1079_p4 = por %p1078_p7, %p1077_p11 }
  0x62   : > { %p1080_p2 = pnand %p1079_p4, %p1073_p8 }
  0x64   : > { %1083 = shalt.err (!%p1080_p2)
}
  0x65   : > { %s1084_s5 = scalar_lea.vmem %s1525_s4, 128  ;;  %s1284_s13 = smov [#allocation2]  }
  0x66   : > { %p1085_p6 = scmp.ne.s32.totalorder %s1525_s4, %s1084_s5  ;;  %s1089_s16 = sshll.u32 %s1284_s13, 4  ;;  %s1090_s16 = int_to_ptr.vmem [resolvable:$false] %s1089_s16 }
  0x67   : > { %s1091_s28 = scalar_lea.vmem %s1090_s16, 256  ;;  %p1092_p9 = scmp.lt.s32.totalorder %s1525_s4, %s1090_s16 }
  0x68   : > { %p1087_p1 = pnand %p1085_p6, %p1071_p13  ;;  %p1093_p10 = scmp.lt.s32.totalorder %s1091_s28, %s1084_s5 }
  0x6a   : > { %p1088_p12 = pneg %p1087_p1  ;;  %p1094_p0 = por %p1093_p10, %p1092_p9 }
  0x6c   : > { %p1095_p7 = pnand %p1094_p0, %p1088_p12 }
  0x6e   : > { %1098 = shalt.err (!%p1095_p7)
}
  0x6f   : > { %880 = dma.hbm_to_vmem [thread:$0]  (!%p1531_p3), %s1540_s21, 128, %s1525_s4, %s224_s30  }
  0x70   : > { %s1099_s20 = scalar_lea.hbm %s1545_s15, 1024  ;;  %p1802_p4 = pneg %p1414_p5 }
  0x71   : > { %p1100_p2 = scmp.ne.s32.totalorder %s1545_s15, %s1099_s20  ;;  %s1104_s12 = scalar_lea.hbm %s1753_s3, 3072 }
  0x72   : > { %p1105_p13 = scmp.lt.u32.totalorder %s1545_s15, %s1753_s3  ;;  %p1106_p8 = scmp.lt.u32.totalorder %s1104_s12, %s1099_s20 }
  0x73   : > { %p1102_p9 = pnand %p1100_p2, %p1802_p4  ;;  %p1108_p6 = scmp.lt.u32.totalorder %s1099_s20, %s1545_s15 }
  0x74   : > { %p1107_p11 = por %p1106_p8, %p1105_p13 }
  0x75   : > { %p1103_p12 = pneg %p1102_p9 }
  0x76   : > { %p1109_p3 = por %p1108_p6, %p1107_p11 }
  0x78   : > { %p1110_p1 = pnand %p1109_p3, %p1103_p12 }
  0x7a   : > { %1113 = shalt.err (!%p1110_p1)
}
  0x7b   : > { %s1114_s4 = scalar_lea.vmem %s1573_s11, 1024  ;;  %p1803_p0 = pmov %p1802_p4 }
  0x7c   : > { %p1115_p10 = scmp.ne.s32.totalorder %s1573_s11, %s1114_s4  ;;  %s1285_s30 = smov [#allocation7]  }
  0x7d   : > { %s1119_s21 = sshll.u32 %s1285_s30, 4  ;;  %s1120_s21 = int_to_ptr.vmem [resolvable:$false] %s1119_s21 }
  0x7e   : > { %p1117_p7 = pnand %p1115_p10, %p1803_p0  ;;  %s1121_s24 = scalar_lea.vmem %s1120_s21, 2048 }
  0x7f   : > { %p1122_p4 = scmp.lt.s32.totalorder %s1573_s11, %s1120_s21  ;;  %p1123_p9 = scmp.lt.s32.totalorder %s1121_s24, %s1114_s4 }
  0x80   : > { %p1118_p2 = pneg %p1117_p7 }
  0x81   : > { %p1124_p13 = por %p1123_p9, %p1122_p4 }
  0x83   : > { %p1125_p8 = pnand %p1124_p13, %p1118_p2 }
  0x85   : > { %1128 = shalt.err (!%p1125_p8)
}
  0x86   : > { %s1286_s5 = smov 256   ;;  %s1287_s13 = smov 16  }
  0x87   : > { %886 = dma.hbm_to_vmem [thread:$0]  (!%p1414_p5), %s1545_s15, 1024, %s1573_s11, %s1420_s7, %s1286_s5, %s1286_s5, %s1287_s13  }
  0x88   : > { %p1804_p12 = scmp.ne.s32.totalorder %s1785_s9, 0 }
  0x89   : > { %s303_s16 = sand.u32 (!%p1804_p12), 1, %s1255_s25   ;;  %p1805_p11 = scmp.ne.s32.totalorder (!%p1804_p12), %s1789_s8, 0 }
  0x8a   : > { %301 = sbr.rel (%p1804_p12) target bundleno = 969 (0x3c9), region = 40  ;;  %s827_s28 = sshll.u32 (!%p1804_p12), %s303_s16, 3 }
  0x8b   : > { %s304_s20 = scalar_lea.sflag (!%p1804_p12), [#allocation3], %s303_s16  ;;  %s307_s2 = scalar_lea.vmem (!%p1804_p12), [#allocation2], %s827_s28 }
  0x91   : > { %1214 = dma.done.wait (%p1805_p11), %s304_s20, 128  }
  0x92   : > { %1216 = vsyncadd (%p1805_p11), %s304_s20, 4294967168  ;;  %s1806_s23 = sld [smem:[#allocation20_spill]]  ;;  %s312_s12 = sand.u32 1, %s1459_s1  }
  0x93   : > { %s314_s17 = sand.u32 1, %s1243_s22   ;;  %s313_s11 = scalar_lea.sflag [#allocation6], %s312_s12 }
  0x94   : > { %s1608_s7 = sshll.u32 %s314_s17, 4 }
  0x95   : > { %s316_s9 = scalar_lea.vmem [#allocation5], %s1608_s7 }
  0x98   : > { %p1807_p5 = scmp.ne.s32.totalorder %s1806_s23, 0 }
  0x9a   : > { %1218 = dma.done.wait (%p1807_p5), %s313_s11, 1280  }
  0x9b   : > { %1220 = vsyncadd (%p1807_p5), %s313_s11, 4294966016  ;;  %s1808_s15 = sld [smem:[#allocation15_spill]]  ;;  %s829_s8 = sshll.u32 %s314_s17, 6 }
  0x9c   : > { %s366_s26 = sand.u32 1, %s1231_s19   ;;  %s1809_s21 = sld [smem:[#allocation25_spill]] }
  0x9d   : > { %s830_s10 = sshll.u32 %s366_s26, 4  ;;  %s1810_s28 = sld [smem:[#allocation26_spill]] }
  0x9e   : > { %s1632_s23 = scalar_lea.vmem [#allocation7], %s829_s8  ;;  %s1634_s12 = scalar_lea.vmem [#allocation8], %s830_s10 }
  0xa1   : > { %p369_p6 = scmp.lt.s32.totalorder %s1808_s15, 2  ;;  %p832_p3 = scmp.ne.s32.totalorder %s1808_s15, 0 }
  0xa2   : > { %v1288_v0 = vmov (!%p832_p3), 0.0  }
  0xa3   : > { %s1620_s1 = scalar_select %p369_p6, %s1808_s15, 2 }
  0xa4   : > { %380 = sbr.rel (%p832_p3) target bundleno = 171 (0xab), region = 56  ;;  %381 = vst [vmem:[%s1634_s12] sm:$0xff] (!%p832_p3), %v1288_v0  ;;  %382 = vst [vmem:[%s1634_s12 + $0x8] sm:$0xff] (!%p832_p3), %v1288_v0 }
  0xa5   : > { %s371_s24 = scalar_lea.vmem %s1809_s21, %s1620_s1  ;;  %s831_s5 = sshll.u32 %s1620_s1, 2 }
  0xa6   : > { %s1630_s20 = scalar_lea.vmem %s1810_s28, %s831_s5 }
  0xab PF: > { %v383_v1 = vld [vmem:[%s307_s2] sm:$0xff]  ;;  %vm384_vm0 = vcmask 261120   ;;  %v1013_v8 = vld [vmem:[%s316_s9] sm:$0xff]   ;;  %v1289_v9 = vmov 0.0   ;;  %vm1290_vm1 = vmmov 0   ;;  %v1291_v25 = vmov 0  }
  0xac   : > { %v385_v2 = vsel %vm384_vm0, %v383_v1, 0.0  ;;  %860 = vmatprep.subr.bf16.mxu0 %v1289_v9  ;;  %864 = vmatprep.mubr.msk.bf16.mxu0 %vm1290_vm1, %v1289_v9  ;;  %v1014_v10 = vld [vmem:[%s316_s9 + $0x8] sm:$0xff]   ;;  %v1018_v18 = vld [vmem:[%s1632_s23 + $0x4] ss:$16 sps:$4 sm:$0xff]   ;;  %v1020_v20 = vld [vmem:[%s1632_s23] ss:$16 sps:$4 sm:$0xff]   ;;  %v478_v34 = vlaneseq }
  0xad   : > { %386 = vadd.xlane.f32.xlu0 %v385_v2  ;;  %861 = vmatpush3.bf16.msra.mxu0 %v1013_v8  ;;  %v1017_v17 = vld [vmem:[%s1632_s23 + $0xc] ss:$16 sps:$4 sm:$0xff]   ;;  %v1015_v19 = vld [vmem:[%s1632_s23 + $0x8] ss:$16 sps:$4 sm:$0xff]   ;;  %v1024_v22 = vld [vmem:[%s1632_s23 + $0x24] ss:$16 sps:$4 sm:$0xff]  }
  0xae   : > { %862 = vmatprep.subr.bf16.mxu0 %v1289_v9  ;;  %541 = vmatprep.subr.bf16.mxu1 %v1018_v18  ;;  %v1023_v21 = vld [vmem:[%s1632_s23 + $0x2c] ss:$16 sps:$4 sm:$0xff]   ;;  %v1021_v23 = vld [vmem:[%s1632_s23 + $0x28] ss:$16 sps:$4 sm:$0xff]   ;;  %v1026_v24 = vld [vmem:[%s1632_s23 + $0x20] ss:$16 sps:$4 sm:$0xff]  }
  0xaf   : > { %542 = vmatpush1.bf16.msra.mxu1 %v1020_v20  ;;  %573 = vmatprep.mubr.bf16.mxu1 %v1291_v25  ;;  %v833_v26 = vld [vmem:[%s371_s24] ss:$0 sm:$0xff]  ;;  %v479_v35 = vshrl.u32 %v478_v34, 7  ;;  %s1812_s11 = sld [smem:[#allocation16_spill]]  ;;  %v624_v2 = vld [vmem:[%s1634_s12 + $0x8] sm:$0xff]  ;;  %s660_s15 = sshll.u32 %s1634_s12, 4  ;;  %s1671_s15 = int_to_ptr.vmem [resolvable:$true] %s660_s15 }
  0xb0   : > { %543 = vmatprep.subr.bf16.mxu1 %v1024_v22  ;;  %v476_v37 = vld [vmem:[%s1630_s20] sm:$0xf]  ;;  %s1813_s1 = sld [smem:[#allocation27_spill]]  ;;  %s644_s30 = scalar_lea.sflag [#allocation4], %s366_s26 }
  0xb1   : > { %863 = vmatpush3.bf16.msra.mxu0 %v1014_v10  ;;  %v488_v36 = vsub.s32 2, %v479_v35  ;;  %v492_v38 = vsub.s32 3, %v479_v35  ;;  %v480_v57 = vsub.s32 0, %v479_v35  ;;  %v484_v58 = vsub.s32 1, %v479_v35  ;;  %v623_v0 = vld [vmem:[%s1634_s12] sm:$0xff]  ;;  %s1129_s21 = scalar_lea.vmem %s1671_s15, 256 }
  0xb2   : > { %582 = vmatprep.subr.bf16.mxu0 %v1017_v17  ;;  %p1130_p1 = scmp.ne.s32.totalorder %s1671_s15, %s1129_s21  ;;  %p1814_p10 = scmp.ne.s32.totalorder %s1797_s27, 0 }
  0xb3   : > { %544 = vmatpush1.bf16.msra.mxu1 %v1026_v24  ;;  %v489_v39 = vrot.slane %v476_v37, %v488_v36  ;;  %v493_v40 = vrot.slane %v476_v37, %v492_v38  ;;  %v481_v59 = vrot.slane %v476_v37, %v480_v57  ;;  %v485_v60 = vrot.slane %v476_v37, %v484_v58  ;;  %s1292_s24 = smov [#allocation8]  }
  0xb4   : > { %p1131_p0 = pnand %p1130_p1, %p1814_p10  ;;  %s1133_s5 = sshll.u32 %s1292_s24, 4  ;;  %s1134_s5 = int_to_ptr.vmem [resolvable:$false] %s1133_s5 }
  0xb5   : > { %s856_s9 = sshll.u32 %s1812_s11, 8  ;;  %s1135_s13 = scalar_lea.vmem %s1134_s5, 512 }
  0xb6   : > { %s1669_s4 = scalar_lea.hbm %s1813_s1, %s856_s9  ;;  %p1132_p7 = pneg %p1131_p0 }
  0xb7   : > { %p1136_p2 = scmp.lt.s32.totalorder %s1671_s15, %s1134_s5  ;;  %p1137_p4 = scmp.lt.s32.totalorder %s1135_s13, %s1129_s21 }
  0xb9   : > { %p1138_p9 = por %p1137_p4, %p1136_p2 }
  0xbb   : > { %p1139_p13 = pnand %p1138_p9, %p1132_p7 }
 0x13a   : > { %v387_v3 = vpop.xlane.xlu0 %386 }
 0x13b   : > { %v389_v4 = vmul.f32 0.03125, %v387_v3 }
 0x13d   : > { %v390_v5 = vsub.f32 %v383_v1, %v389_v4 }
 0x13f   : > { %v391_v6 = vmul.f32 %v390_v5, %v390_v5 }
 0x141   : > { %v392_v7 = vsel %vm384_vm0, %v391_v6, 0.0 }
 0x142   : > { %393 = vadd.xlane.f32.xlu0 %v392_v7 }
 0x1cf   : > { %v394_v11 = vpop.xlane.xlu0 %393 }
 0x1d0   : > { %v395_v12 = vmul.f32 0.03125, %v394_v11 }
 0x1d2   : > { %v396_v13 = vadd.f32 1e-05, %v395_v12 }
 0x1d4   : > { %1027 = vrsqrt.f32 %v396_v13 }
 0x1de   : > { %v1028_v14 = vpop.eup %1027 }
 0x1df   : > { %v398_v15 = vmul.f32 %v1028_v14, %v390_v5 }
 0x1e1   : > { %v399_v16 = vpack.c.bf16 %v398_v15, %v398_v15 }
 0x1e3   : > { %865 = vmatmul.mubr.msk.bf16.vlgmr.msra.gmra.mrb[0].mxu0 %vm384_vm0, %v399_v16 }
 0x1e4   : > { %583 = vmatpush1.bf16.msra.mxu0 %v1015_v19  ;;  %614 = vmatprep.mubr.bf16.mxu0 %v1291_v25 }
 0x1e5   : > { %584 = vmatprep.subr.bf16.mxu0 %v1023_v21 }
 0x1e8   : > { %585 = vmatpush1.bf16.msra.mxu0 %v1021_v23 }
 0x2b6   : > { %v460_v27 = vpop.f32.mrb[0].mxu0 }
 0x2b7   : > { %v461_v28 = vadd.f32 %v833_v26, %v460_v27  ;;  %v866_v29 = vpop.f32.mrb[1].mxu0 }
 0x2b8   : > { %v463_v30 = vpop.f32.mrb[2].mxu0 }
 0x2b9   : > { %1029 = vtanh.f32 %v461_v28  ;;  %v867_v31 = vpop.f32.mrb[3].mxu0 }
 0x2c3   : > { %v1030_v32 = vpop.eup %1029 }
 0x2c4   : > { %v467_v33 = vpack.c.bf16 %v1030_v32, %v1030_v32 }
 0x2c6   : > { %845 = vmatmul.mubr.msk.bf16.vlgmr.msra.gmra.mrb[0].mxu1 %vm384_vm0, %v467_v33  ;;  %846 = vmatmul.mubr.msk.bf16.vlgmr.msra.gmra.mrb[4].mxu0 %vm384_vm0, %v467_v33 }
 0x399   : > { %v575_v41 = vpop.f32.mrb[0].mxu1  ;;  %v616_v42 = vpop.f32.mrb[4].mxu0 }
 0x39a   : > { %v617_v43 = vadd.f32 %v616_v42, %v489_v39  ;;  %v577_v44 = vpop.f32.mrb[1].mxu1  ;;  %v618_v45 = vpop.f32.mrb[5].mxu0  ;;  %v576_v61 = vadd.f32 %v575_v41, %v481_v59 }
 0x39b   : > { %v619_v46 = vadd.f32 %v618_v45, %v493_v40  ;;  %v579_v47 = vpop.f32.mrb[2].mxu1  ;;  %v620_v48 = vpop.f32.mrb[6].mxu0  ;;  %v578_v63 = vadd.f32 %v577_v44, %v485_v60 }
 0x39c   : > { %v847_v49 = vmul.f32 -1.442695, %v617_v43  ;;  %v580_v50 = vpop.f32.mrb[3].mxu1  ;;  %v621_v51 = vpop.f32.mrb[7].mxu0 }
 0x39d   : > { %v848_v52 = vmul.f32 -1.442695, %v619_v46 }
 0x39e   : > { %1031 = vpow2.f32 %v847_v49 }
 0x39f   : > { %1033 = vpow2.f32 %v848_v52 }
 0x3a8   : > { %v1032_v53 = vpop.eup %1031 }
 0x3a9   : > { %v1034_v54 = vpop.eup %1033  ;;  %v631_v55 = vadd.f32 1.0, %v1032_v53 }
 0x3aa   : > { %v632_v56 = vadd.f32 1.0, %v1034_v54 }
 0x3ab   : > { %1035 = vrcp.f32 %v631_v55 }
 0x3ac   : > { %1037 = vrcp.f32 %v632_v56 }
 0x3b5   : > { %v1036_v62 = vpop.eup %1035 }
 0x3b6   : > { %v1038_v1 = vpop.eup %1037  ;;  %v637_v3 = vmul.f32 %v1036_v62, %v576_v61 }
 0x3b7   : > { %v638_v4 = vmul.f32 %v1038_v1, %v578_v63 }
 0x3b8   : > { %v639_v5 = vadd.f32 %v637_v3, %v623_v0 }
 0x3b9   : > { %v640_v6 = vadd.f32 %v638_v4, %v624_v2 }
 0x3ba   : > { %641 = vst [vmem:[%s1634_s12] sm:$0xff] %v639_v5 }
 0x3bb   : > { %642 = vst [vmem:[%s1634_s12 + $0x8] sm:$0xff] %v640_v6 }
 0x3bc   : > { %1142 = shalt.err (!%p1139_p13)
}
 0x3bd   : > { %s1143_s26 = scalar_lea.hbm %s1669_s4, 256  ;;  %s1147_s20 = scalar_lea.hbm %s1813_s1, 512 }
 0x3be   : > { %p1144_p8 = scmp.ne.s32.totalorder %s1669_s4, %s1143_s26  ;;  %p1148_p5 = scmp.lt.u32.totalorder %s1669_s4, %s1813_s1 }
 0x3bf   : > { %p1149_p6 = scmp.lt.u32.totalorder %s1147_s20, %s1143_s26  ;;  %p1151_p1 = scmp.lt.u32.totalorder %s1143_s26, %s1669_s4 }
 0x3c0   : > { %p1145_p12 = pnand %p1144_p8, %p1814_p10 }
 0x3c1   : > { %p1150_p3 = por %p1149_p6, %p1148_p5 }
 0x3c2   : > { %p1146_p11 = pneg %p1145_p12 }
 0x3c3   : > { %p1152_p0 = por %p1151_p1, %p1150_p3 }
 0x3c5   : > { %p1153_p7 = pnand %p1152_p0, %p1146_p11 }
 0x3c7   : > { %1156 = shalt.err (!%p1153_p7)
}
 0x3c8   : > { %875 = dma.vmem_to_hbm [thread:$0]  (%p1814_p10), %s1671_s15, 256, %s1669_s4, %s644_s30  }
 0x3c9 PF: > { %p892_p2 = scmp.ge.s32.totalorder %s1279_s6, 2  ;;  %s672_s2 = sand.u32 1, %s1227_s18  }
 0x3ca   : > { %p1815_p4 = scmp.ne.s32.totalorder %s1799_s14, 0  ;;  %s673_s17 = scalar_lea.sflag [#allocation4], %s672_s2 }
 0x3cc   : > { %p888_p9 = pnand %p892_p2, %p1815_p4 }
 0x3ce   : > { %1222 = dma.done.wait (!%p888_p9), %s673_s17, 256  }
 0x3cf   : > { %1224 = vsyncadd (!%p888_p9), %s673_s17, 4294967040  ;;  %s24_s6 = sadd.s32 1, %s1279_s6   ;;  %s1817_s27 = sld [smem:[#allocation12_spill]] }
 0x3d0   : > { %p1703_p13 = scmp.ge.s32.totalorder %s24_s6, 8   ;;  %s1818_s20 = sld [smem:[#allocation23_spill]] }
 0x3d1   : > { %s1819_s11 = sld [smem:[#allocation13_spill]]  ;;  %s1820_s23 = sld [smem:[#allocation21_spill]] }
 0x3d2   : > { %s1821_s9 = sld [smem:[#allocation14_spill]]  ;;  %s1822_s26 = sld [smem:[#allocation22_spill]] }
 0x3d3   : > { %s1823_s28 = sld [smem:[#allocation17_spill]]  ;;  %s1824_s14 = sld [smem:[#allocation18_spill]] }
 0x3d4   : > { %s1825_s30 = sld [smem:[#allocation19_spill]]  ;;  %s1826_s18 = smov %s1231_s19 }
 0x3d5   : > { %s1827_s19 = smov %s1817_s27  ;;  %s1828_s21 = smov %s1243_s22 }
 0x3d6   : > { %s1830_s24 = smov %s1255_s25  ;;  %s1832_s27 = smov %s1271_s29 }
 0x3d7   : > { %s1829_s22 = smov %s1819_s11  ;;  %23 = sbr.rel (!%p1703_p13) target bundleno = 17 (0x11), region = 119 }
 0x3d8   : > { %s1831_s25 = smov %s1821_s9 }
 0x3d9   : > { %s1833_s29 = smov %s1824_s14 }
 0x3de   :  { %678 = vsyncpa [#allocation3], 1 }
 0x3df   :  { %680 = vsyncpa [#allocation3 + $0x1], 1 }
 0x3e0   :  { %681 = vsyncpa [#allocation6], 1 }
 0x3e1   :  { %683 = vsyncpa [#allocation6 + $0x1], 1 }
 0x3e2   :  { %684 = vsyncpa [#allocation4], 1 }
 0x3e3   :  { %686 = vsyncpa [#allocation4 + $0x1], 1 }

</bundles_post_ra>
